<compile_context>
chip_gen: v7x
topology: tpu7x:2x2x1
jax: 0.10.0
libtpu: 0.0.40
codegen_flags: <defaults>
</compile_context>

<pallas_src>
import math

import jax
import jax.numpy as jnp
from jax.experimental import pallas as pl
from jax.experimental.pallas import tpu as pltpu


def _round_up(x, m):
    return (x + m - 1) // m * m


# ---------------------------------------------------------------------------
# Kernel: fused (advantage || value) MLP over one batch tile.
# ---------------------------------------------------------------------------
def make_fused_mlp_kernel(n_layers, row_offsets, row_sizes, compute_dtype):
    """All params live in one VMEM slab; layers are static slices of it."""

    def kernel(w_ref, b_ref, x_ref, out_ref):
        h = x_ref[...].astype(compute_dtype)            # (TB, K_pad)
        for i in range(n_layers):
            # Static slices of the packed weight slab (zero runtime cost).
            w = w_ref[pl.ds(row_offsets[i], row_sizes[i]), :]   # (rows_i, P)
            b = b_ref[pl.ds(i, 1), :]                           # (1, P) f32
            y = jnp.dot(h, w, preferred_element_type=jnp.float32) + b
            if i < n_layers - 1:
                y = jnp.maximum(y, 0.0)                 # ReLU in f32 (VPU)
                h = y.astype(compute_dtype)
            else:
                # Lane-dense (TB, 128) store: [adv (A) | value (1) | zero pad].
                out_ref[...] = y.astype(out_ref.dtype)

    return kernel


# ---------------------------------------------------------------------------
# Host-side packing: fuse + pad all layer params into tile-aligned slabs.
# ---------------------------------------------------------------------------
def pack_fused_params(adv_params, value_params, layer_sizes, param_dtype):
    n_layers = len(layer_sizes) - 1
    A = layer_sizes[-1]

    # Fused output widths per layer: [2*h1, 2*h2, ..., A+1] -> pad to 128 lanes.
    fused_out = [2 * layer_sizes[i + 1] for i in range(n_layers - 1)] + [A + 1]
    P = _round_up(max(fused_out + [128]), 128)          # uniform padded lane width
    K_pad = _round_up(layer_sizes[0], 8)                # padded input feature dim

    row_sizes = [K_pad] + [P] * (n_layers - 1)
    row_offsets = [0]
    for s in row_sizes[:-1]:
        row_offsets.append(row_offsets[-1] + s)

    w_blocks, b_rows = [], []
    for i in range(n_layers):
        wa, ba = adv_params[2 * i], adv_params[2 * i + 1]     # (in, out_a), (1, out_a)
        wv, bv = value_params[2 * i], value_params[2 * i + 1]
        out_a, out_v = wa.shape[1], wv.shape[1]

        W = jnp.zeros((row_sizes[i], P), jnp.float32)
        if i == 0:
            # Both branches consume the raw input x -> concat along the output dim.
            fin = layer_sizes[0]
            W = W.at[:fin, :out_a].set(wa)
            W = W.at[:fin, out_a:out_a + out_v].set(wv)
        else:
            # Input is the fused activation [h_adv | h_val | 0...] -> block-diagonal weight.
            ha = layer_sizes[i]                         # both branch hidden widths
            W = W.at[:ha, :out_a].set(wa)
            W = W.at[ha:2 * ha, out_a:out_a + out_v].set(wv)

        b = jnp.zeros((1, P), jnp.float32)
        b = b.at[:, :out_a].set(ba)
        b = b.at[:, out_a:out_a + out_v].set(bv)

        w_blocks.append(W)
        b_rows.append(b)

    w_slab = jnp.concatenate(w_blocks, axis=0).astype(param_dtype)   # (sum rows, P)
    b_slab = jnp.concatenate(b_rows, axis=0)                          # (n_layers, P) f32
    b_pad_rows = _round_up(n_layers, 8)                               # sublane-align bias slab
    if b_pad_rows != n_layers:
        b_slab = jnp.pad(b_slab, ((0, b_pad_rows - n_layers), (0, 0)))

    return w_slab, b_slab, row_offsets, row_sizes, P, K_pad


# ---------------------------------------------------------------------------
# Forward pass.
# ---------------------------------------------------------------------------
def dueling_dqn_forward(x, adv_params, value_params, layer_sizes,
                        param_dtype=jnp.float32, batch_tile=256):
    n_layers = len(layer_sizes) - 1
    A = layer_sizes[-1]
    B, F = x.shape
    assert F == layer_sizes[0]

    w_slab, b_slab, row_offsets, row_sizes, P, K_pad = pack_fused_params(
        adv_params, value_params, layer_sizes, param_dtype)

    # Batch tiling (grid over batch, independent tiles -> "parallel" / megacore-safe).
    TB = _round_up(min(batch_tile, _round_up(B, 8)), 8)
    B_pad = _round_up(B, TB)
    x_pad = jnp.pad(x, ((0, B_pad - B), (0, K_pad - F))).astype(param_dtype)

    kernel = make_fused_mlp_kernel(n_layers, row_offsets, row_sizes,
                                   jnp.dtype(param_dtype))

    total_rows = sum(row_sizes)
    flops = 2 * B_pad * sum(r * P for r in row_sizes)
    bytes_accessed = (x_pad.size * x_pad.dtype.itemsize
                      + w_slab.size * w_slab.dtype.itemsize
                      + b_slab.size * b_slab.dtype.itemsize
                      + B_pad * P * 4)

    heads = pl.pallas_call(
        kernel,
        out_shape=jax.ShapeDtypeStruct((B_pad, P), jnp.float32),
        grid=(B_pad // TB,),
        in_specs=[
            pl.BlockSpec((total_rows, P), lambda i: (0, 0)),      # packed weight slab (resident)
            pl.BlockSpec(b_slab.shape, lambda i: (0, 0)),         # packed f32 biases (resident)
            pl.BlockSpec((TB, K_pad), lambda i: (i, 0)),          # batch tile of x
        ],
        out_specs=pl.BlockSpec((TB, P), lambda i: (i, 0)),        # lane-dense heads tile
        compiler_params=pltpu.CompilerParams(
            dimension_semantics=("parallel",),
            vmem_limit_bytes=32 * 1024 * 1024),
        cost_estimate=pl.CostEstimate(flops=flops, transcendentals=0,
                                      bytes_accessed=bytes_accessed),
    )(w_slab, b_slab, x_pad)

    # Dueling combine as a trivial XLA epilogue (the mean is a cross-batch reduction,
    # so it must live outside the batch-tiled kernel).  Padded rows/columns are sliced
    # off BEFORE the mean so they never perturb it.
    heads = heads[:B]
    adv = heads[:, :A]
    value = heads[:, A:A + 1]
    adv_avg = jnp.mean(adv, axis=0, keepdims=True)    # dim=0 batch mean, exactly as in torch code
    return value + adv - adv_avg


# ---------------------------------------------------------------------------
# Param init (PyTorch nn.Linear-style) and pure-JAX reference.
# ---------------------------------------------------------------------------
def init_params(key, layer_sizes):
    n_layers = len(layer_sizes) - 1

    def make_linear(k, fan_in, fan_out):
        kw, kb = jax.random.split(k)
        bound = 1.0 / math.sqrt(fan_in)
        w = jax.random.uniform(kw, (fan_in, fan_out), jnp.float32, -bound, bound)
        b = jax.random.uniform(kb, (1, fan_out), jnp.float32, -bound, bound)
        return w, b

    keys = jax.random.split(key, 2 * n_layers)

    adv_params = []
    for i in range(n_layers):
        w, b = make_linear(keys[i], layer_sizes[i], layer_sizes[i + 1])
        adv_params += [w, b]

    value_params = []
    for i in range(n_layers):
        out_dim = 1 if i == n_layers - 1 else layer_sizes[i + 1]
        w, b = make_linear(keys[n_layers + i], layer_sizes[i], out_dim)
        value_params += [w, b]

    return adv_params, value_params


def reference_forward(x, adv_params, value_params, layer_sizes):
    n_layers = len(layer_sizes) - 1

    def mlp(h, params):
        for i in range(n_layers):
            w, b = params[2 * i], params[2 * i + 1]
            h = h @ w + b
            if i < n_layers - 1:
                h = jnp.maximum(h, 0.0)
        return h

    adv = mlp(x, adv_params)
    value = mlp(x, value_params)
    adv_avg = jnp.mean(adv, axis=0, keepdims=True)
    return value + adv - adv_avg


if __name__ == "__main__":
    # Pendulum-style setup: 3-dim state, two hidden layers of 32, 5 discretized actions.
    layer_sizes = [3, 32, 32, 5]
    B = 8

    key = jax.random.PRNGKey(0)
    k_x, k_p = jax.random.split(key)
    x = jax.random.normal(k_x, (B, layer_sizes[0]), jnp.float32)
    adv_params, value_params = init_params(k_p, layer_sizes)

    ref = reference_forward(x, adv_params, value_params, layer_sizes)

    # f32 parameter path.
    out_f32 = dueling_dqn_forward(x, adv_params, value_params, layer_sizes,
                                  param_dtype=jnp.float32)
    out_f32 = jax.block_until_ready(out_f32)
    assert out_f32.shape == (B, layer_sizes[-1])
    assert jnp.allclose(out_f32, ref, atol=1e-3, rtol=1e-3), "f32 kernel mismatch vs reference"

    # bf16 MXU-input path (f32 accumulation / bias / relu / combine).
    out_bf16 = dueling_dqn_forward(x, adv_params, value_params, layer_sizes,
                                   param_dtype=jnp.bfloat16)
    out_bf16 = jax.block_until_ready(out_bf16)
    assert out_bf16.shape == (B, layer_sizes[-1])
    assert jnp.allclose(out_bf16, ref, atol=1e-1, rtol=1e-1), "bf16 kernel mismatch vs reference"

    print("KERNEL_OK")
</pallas_src>

<mosaic_0001>
module attributes {stable_mosaic.version = 11 : i64} {
  func.func @kernel(%arg0: i32, %arg1: memref<264x128xf32, #tpu.memory_space<vmem>>, %arg2: memref<8x128xf32, #tpu.memory_space<vmem>>, %arg3: memref<8x8xf32, #tpu.memory_space<vmem>>, %arg4: memref<8x128xf32, #tpu.memory_space<vmem>>) attributes {dimension_semantics = [#tpu.dimension_semantics<parallel>], iteration_bounds = array<i64: 1>, scalar_prefetch = 0 : i64, scratch_operands = 0 : i64, tpu.core_type = #tpu.core_type<tc>, window_params = [{pipeline_mode = #tpu.pipeline_mode<synchronous>, transform_indices = @transform_0, window_bounds = array<i64: 264, 128>}, {pipeline_mode = #tpu.pipeline_mode<synchronous>, transform_indices = @transform_1, window_bounds = array<i64: 8, 128>}, {transform_indices = @transform_2, window_bounds = array<i64: 8, 8>}, {transform_indices = @transform_3, window_bounds = array<i64: 8, 128>}]} {
    %c0 = arith.constant 0 : index
    %c0_0 = arith.constant 0 : index
    %0 = vector.load %arg3[%c0, %c0_0] : memref<8x8xf32, #tpu.memory_space<vmem>>, vector<8x8xf32>
    %c0_1 = arith.constant 0 : index
    %c0_2 = arith.constant 0 : index
    %1 = vector.load %arg1[%c0_1, %c0_2] : memref<264x128xf32, #tpu.memory_space<vmem>>, vector<8x128xf32>
    %c0_3 = arith.constant 0 : index
    %c0_4 = arith.constant 0 : index
    %2 = vector.load %arg2[%c0_3, %c0_4] : memref<8x128xf32, #tpu.memory_space<vmem>>, vector<1x128xf32>
    %cst = arith.constant dense<0.000000e+00> : vector<8x128xf32>
    %3 = tpu.matmul %0, %1, %cst {dimension_numbers = #tpu.dot_dimension_numbers<[1], [0], [0], [1], [0, 0, 1, 1], [], []>} : vector<8x8xf32>, vector<8x128xf32>, vector<8x128xf32> -> vector<8x128xf32>
    %4 = vector.broadcast %2 : vector<1x128xf32> to vector<8x128xf32>
    %5 = arith.addf %3, %4 : vector<8x128xf32>
    %cst_5 = arith.constant 0.000000e+00 : f32
    %6 = vector.broadcast %cst_5 : f32 to vector<8x128xf32>
    %7 = arith.maximumf %5, %6 : vector<8x128xf32>
    %c8 = arith.constant 8 : index
    %c0_6 = arith.constant 0 : index
    %8 = vector.load %arg1[%c8, %c0_6] : memref<264x128xf32, #tpu.memory_space<vmem>>, vector<128x128xf32>
    %c1 = arith.constant 1 : index
    %c0_7 = arith.constant 0 : index
    %9 = vector.load %arg2[%c1, %c0_7] : memref<8x128xf32, #tpu.memory_space<vmem>>, vector<1x128xf32>
    %cst_8 = arith.constant dense<0.000000e+00> : vector<8x128xf32>
    %10 = tpu.matmul %7, %8, %cst_8 {dimension_numbers = #tpu.dot_dimension_numbers<[1], [0], [0], [1], [0, 0, 1, 1], [], []>} : vector<8x128xf32>, vector<128x128xf32>, vector<8x128xf32> -> vector<8x128xf32>
    %11 = vector.broadcast %9 : vector<1x128xf32> to vector<8x128xf32>
    %12 = arith.addf %10, %11 : vector<8x128xf32>
    %cst_9 = arith.constant 0.000000e+00 : f32
    %13 = vector.broadcast %cst_9 : f32 to vector<8x128xf32>
    %14 = arith.maximumf %12, %13 : vector<8x128xf32>
    %c136 = arith.constant 136 : index
    %c0_10 = arith.constant 0 : index
    %15 = vector.load %arg1[%c136, %c0_10] : memref<264x128xf32, #tpu.memory_space<vmem>>, vector<128x128xf32>
    %c2 = arith.constant 2 : index
    %c0_11 = arith.constant 0 : index
    %16 = vector.load %arg2[%c2, %c0_11] : memref<8x128xf32, #tpu.memory_space<vmem>>, vector<1x128xf32>
    %cst_12 = arith.constant dense<0.000000e+00> : vector<8x128xf32>
    %17 = tpu.matmul %14, %15, %cst_12 {dimension_numbers = #tpu.dot_dimension_numbers<[1], [0], [0], [1], [0, 0, 1, 1], [], []>} : vector<8x128xf32>, vector<128x128xf32>, vector<8x128xf32> -> vector<8x128xf32>
    %18 = vector.broadcast %16 : vector<1x128xf32> to vector<8x128xf32>
    %19 = arith.addf %17, %18 : vector<8x128xf32>
    %c0_13 = arith.constant 0 : index
    %c0_14 = arith.constant 0 : index
    %20 = vector.load %arg4[%c0_13, %c0_14] : memref<8x128xf32, #tpu.memory_space<vmem>>, vector<8x128xf32>
    tpu.vector_store %arg4[%c0_13, %c0_14], %19 {strides = array<i32>} : memref<8x128xf32, #tpu.memory_space<vmem>>, vector<8x128xf32>,
    return
  }
  func.func @transform_0(%arg0: i32) -> (i32, i32) {
    %c0_i32 = arith.constant 0 : i32
    %c0_i32_0 = arith.constant 0 : i32
    %c0_i32_1 = arith.constant 0 : i32
    return %c0_i32, %c0_i32_0 : i32, i32
  }
  func.func @transform_1(%arg0: i32) -> (i32, i32) {
    %c0_i32 = arith.constant 0 : i32
    %c0_i32_0 = arith.constant 0 : i32
    %c0_i32_1 = arith.constant 0 : i32
    return %c0_i32, %c0_i32_0 : i32, i32
  }
  func.func @transform_2(%arg0: i32) -> (i32, i32) {
    %c0_i32 = arith.constant 0 : i32
    %c0_i32_0 = arith.constant 0 : i32
    return %arg0, %c0_i32 : i32, i32
  }
  func.func @transform_3(%arg0: i32) -> (i32, i32) {
    %c0_i32 = arith.constant 0 : i32
    %c0_i32_0 = arith.constant 0 : i32
    return %arg0, %c0_i32 : i32, i32
  }
}

</mosaic_0001>

<bundles_post_ra>
// kernel: tpu_custom_call.1
= control target key start
LH: loop header
LB: loop body
LE: loop exit
PB: predicated region body
PF: predicated region fallthrough
CT: control target
= control target key end

     0   :  { %8 = vsyncpa [#allocation3], 0  ;;  %s703_s0 = inlined_call_operand.hbm [shape: f32[264,128], index: 0, kind: input, shape index: {}]   ;;  %s704_s1 = inlined_call_operand.hbm [shape: f32[8,128], index: 1, kind: input, shape index: {}]   ;;  %s705_s2 = inlined_call_operand.hbm [shape: f32[8,8], index: 2, kind: input, shape index: {}]   ;;  %s706_s3 = inlined_call_operand.hbm [shape: f32[8,128], index: 3, kind: output, shape index: {}]  }
   0x1   :  { %9 = vsyncpa [#allocation6], 0 }
   0x2   :  { %10 = vsyncpa [#allocation4], 0  ;;  %s600_s12 = smov [#allocation5]   ;;  %s601_s14 = smov [#allocation2]  }
   0x3   :  { %s29_s13 = sshll.u32 %s600_s12, 4  ;;  %s16_s15 = sshll.u32 %s601_s14, 4  ;;  %s30_s13 = int_to_ptr.vmem [resolvable:$true] %s29_s13  ;;  %s629_s15 = int_to_ptr.vmem [resolvable:$true] %s16_s15 }
   0x4   :  { %s506_s18 = scalar_lea.hbm %s704_s1, 128 }
   0x5   :  { %p507_p0 = scmp.ne.s32.totalorder %s704_s1, %s506_s18  ;;  %p510_p1 = scmp.lt.u32.totalorder %s506_s18, %s704_s1 }
   0x7   :  { %p512_p2 = pnand %p510_p1, %p507_p0 }
   0x9   :  { %515 = shalt.err (!%p512_p2)
}
   0xa   :  { %s516_s23 = scalar_lea.vmem %s30_s13, 128  ;;  %p521_p4 = scmp.lt.s32.totalorder %s30_s13, %s30_s13 }
   0xb   :  { %p517_p3 = scmp.ne.s32.totalorder %s30_s13, %s516_s23  ;;  %p522_p5 = scmp.lt.s32.totalorder %s516_s23, %s516_s23 }
   0xd   :  { %p523_p6 = por %p522_p5, %p521_p4 }
   0xf   :  { %p524_p7 = pnand %p523_p6, %p517_p3 }
  0x11   :  { %527 = shalt.err (!%p524_p7)
}
  0x12   :  { %32 = dma.hbm_to_vmem [thread:$0]  %s704_s1, 128, %s30_s13, [#allocation6]  }
  0x13   :  { %s528_s28 = scalar_lea.hbm %s703_s0, 4224 }
  0x14   :  { %p529_p8 = scmp.ne.s32.totalorder %s703_s0, %s528_s28  ;;  %p532_p9 = scmp.lt.u32.totalorder %s528_s28, %s703_s0 }
  0x16   :  { %p534_p10 = pnand %p532_p9, %p529_p8 }
  0x18   :  { %537 = shalt.err (!%p534_p10)
}
  0x19   :  { %s538_s6 = scalar_lea.vmem %s629_s15, 4224  ;;  %p543_p12 = scmp.lt.s32.totalorder %s629_s15, %s629_s15 }
  0x1a   :  { %p539_p11 = scmp.ne.s32.totalorder %s629_s15, %s538_s6  ;;  %p544_p13 = scmp.lt.s32.totalorder %s538_s6, %s538_s6 }
  0x1c   :  { %p545_p0 = por %p544_p13, %p543_p12 }
  0x1e   :  { %p546_p1 = pnand %p545_p0, %p539_p11 }
  0x20   :  { %549 = shalt.err (!%p546_p1)
}
  0x21   :  { %s602_s1 = smov 128   ;;  %s603_s7 = smov 8  }
  0x22   :  { %22 = dma.hbm_to_vmem [thread:$0]  %s703_s0, 4224, %s629_s15, [#allocation3], %s602_s1, %s602_s1, %s603_s7  }
  0x23   :  { %s604_s10 = smov [#allocation7]   ;;  %s550_s14 = scalar_lea.hbm %s705_s2, 128 }
  0x24   :  { %s39_s11 = sshll.u32 %s604_s10, 4  ;;  %p551_p2 = scmp.ne.s32.totalorder %s705_s2, %s550_s14  ;;  %s40_s11 = int_to_ptr.vmem [resolvable:$true] %s39_s11 }
  0x25   :  { %p554_p3 = scmp.lt.u32.totalorder %s550_s14, %s705_s2 }
  0x27   :  { %p556_p4 = pnand %p554_p3, %p551_p2 }
  0x29   :  { %559 = shalt.err (!%p556_p4)
}
  0x2a   :  { %s560_s20 = scalar_lea.vmem %s40_s11, 128  ;;  %p565_p6 = scmp.lt.s32.totalorder %s40_s11, %s40_s11 }
  0x2b   :  { %p561_p5 = scmp.ne.s32.totalorder %s40_s11, %s560_s20  ;;  %p566_p7 = scmp.lt.s32.totalorder %s560_s20, %s560_s20 }
  0x2d   :  { %p567_p8 = por %p566_p7, %p565_p6 }
  0x2f   :  { %p568_p9 = pnand %p567_p8, %p561_p5 }
  0x31   :  { %571 = shalt.err (!%p568_p9)
}
  0x32   :  { %42 = dma.hbm_to_vmem [thread:$0]  %s705_s2, 128, %s40_s11, [#allocation6]  }
  0x33   :  { %594 = dma.done.wait [#allocation3], 4224  }
  0x34   :  { %595 = vsyncadd [#allocation3], 4294963072 }
  0x35   :  { %596 = dma.done.wait [#allocation6], 256  }
  0x36   :  { %597 = vsyncadd [#allocation6], 4294967040  ;;  %v605_v0 = vmov 0.0   ;;  %vm606_vm0 = vmmov 0   ;;  %v607_v1 = vmov 0.0|0.0   ;;  %vm59_vm1 = vcmask 64512  }
  0x37   :  { %374 = vmatprep.subr.mxu0 %v605_v0  ;;  %376 = vmatprep.mubr.msk.f32.mxu0 %vm606_vm0, %v605_v0  ;;  %v53_v2 = vld [vmem:[#allocation2] sm:$0xff]  ;;  %v52_v3 = vld [vmem:[#allocation7] sm:$0xff]  ;;  %v134_v4 = vld [vmem:[#allocation2 + $0x8] sm:$0xff]  ;;  %s608_s2 = smov [#allocation8]  }
  0x38   :  { %449 = vmatprep.subr.bf16.mxu1 %v607_v1  ;;  %411 = vmatprep.mubr.msk.f32.mxu1 %vm606_vm0, %v605_v0  ;;  %v135_v5 = vld [vmem:[#allocation2 + $0x10] sm:$0xff]  ;;  %v136_v6 = vld [vmem:[#allocation2 + $0x18] sm:$0xff]  ;;  %v137_v7 = vld [vmem:[#allocation2 + $0x20] sm:$0xff]  ;;  %s324_s21 = sshll.u32 %s608_s2, 4  ;;  %s325_s21 = int_to_ptr.vmem [resolvable:$true] %s324_s21 }
  0x39   :  { %375 = vmatpush3.msra.mxu0 %v53_v2  ;;  %v450_v8 = vpack.c.bf16 %v135_v5, %v134_v4  ;;  %v453_v9 = vpack.c.bf16 %v137_v7, %v136_v6  ;;  %v138_v10 = vld [vmem:[#allocation2 + $0x28] sm:$0xff]  ;;  %v139_v11 = vld [vmem:[#allocation2 + $0x30] sm:$0xff]  ;;  %v140_v13 = vld [vmem:[#allocation2 + $0x38] sm:$0xff]  ;;  %s572_s22 = scalar_lea.vmem %s325_s21, 128  ;;  %p577_p11 = scmp.lt.s32.totalorder %s325_s21, %s325_s21 }
  0x3a   :  { %377 = vmatmul.mubr.msk.f32.vlgmr.msra.gmra.mrb[0].mxu0 %vm59_vm1, %v52_v3  ;;  %473 = vmatprep.subr.bf16.mxu0 %v607_v1  ;;  %v456_v12 = vpack.c.bf16 %v139_v11, %v138_v10  ;;  %v141_v14 = vld [vmem:[#allocation2 + $0x40] sm:$0xff]  ;;  %v142_v16 = vld [vmem:[#allocation2 + $0x48] sm:$0xff]  ;;  %v143_v17 = vld [vmem:[#allocation2 + $0x50] sm:$0xff]  ;;  %p573_p10 = scmp.ne.s32.totalorder %s325_s21, %s572_s22  ;;  %p578_p12 = scmp.lt.s32.totalorder %s572_s22, %s572_s22 }
  0x3b   :  { %446 = vmatprep.mubr.msk.f32.mxu0 %vm606_vm0, %v605_v0  ;;  %451 = vmatpush3.bf16.msra.mxu1 %v450_v8  ;;  %v459_v15 = vpack.c.bf16 %v141_v14, %v140_v13  ;;  %v462_v18 = vpack.c.bf16 %v143_v17, %v142_v16  ;;  %v144_v19 = vld [vmem:[#allocation2 + $0x58] sm:$0xff]  ;;  %v145_v20 = vld [vmem:[#allocation2 + $0x60] sm:$0xff]  ;;  %v146_v22 = vld [vmem:[#allocation2 + $0x68] sm:$0xff] }
  0x3c   :  { %452 = vmatprep.subr.bf16.mxu1 %v607_v1  ;;  %v465_v21 = vpack.c.bf16 %v145_v20, %v144_v19  ;;  %v147_v23 = vld [vmem:[#allocation2 + $0x70] sm:$0xff]  ;;  %v148_v25 = vld [vmem:[#allocation2 + $0x78] sm:$0xff]  ;;  %v149_v26 = vld [vmem:[#allocation2 + $0x80] sm:$0xff]  ;;  %p579_p13 = por %p578_p12, %p577_p11 }
  0x3d   :  { %v468_v24 = vpack.c.bf16 %v147_v23, %v146_v22  ;;  %v471_v27 = vpack.c.bf16 %v149_v26, %v148_v25  ;;  %v226_v28 = vld [vmem:[#allocation2 + $0x88] sm:$0xff]  ;;  %v227_v29 = vld [vmem:[#allocation2 + $0x90] sm:$0xff]  ;;  %v228_v30 = vld [vmem:[#allocation2 + $0x98] sm:$0xff] }
  0x3e   :  { %v474_v31 = vpack.c.bf16 %v227_v29, %v226_v28  ;;  %v229_v32 = vld [vmem:[#allocation2 + $0xa0] sm:$0xff]  ;;  %v230_v34 = vld [vmem:[#allocation2 + $0xa8] sm:$0xff]  ;;  %v231_v35 = vld [vmem:[#allocation2 + $0xb0] sm:$0xff]  ;;  %p580_p0 = pnand %p579_p13, %p573_p10 }
  0x3f   :  { %454 = vmatpush3.bf16.msra.mxu1 %v453_v9  ;;  %v477_v33 = vpack.c.bf16 %v229_v32, %v228_v30  ;;  %v480_v36 = vpack.c.bf16 %v231_v35, %v230_v34  ;;  %v232_v37 = vld [vmem:[#allocation2 + $0xb8] sm:$0xff]  ;;  %v233_v38 = vld [vmem:[#allocation2 + $0xc0] sm:$0xff]  ;;  %v234_v40 = vld [vmem:[#allocation2 + $0xc8] sm:$0xff] }
  0x40   :  { %455 = vmatprep.subr.bf16.mxu1 %v607_v1  ;;  %475 = vmatpush3.bf16.msra.mxu0 %v474_v31  ;;  %v483_v39 = vpack.c.bf16 %v233_v38, %v232_v37  ;;  %v235_v41 = vld [vmem:[#allocation2 + $0xd0] sm:$0xff]  ;;  %v236_v43 = vld [vmem:[#allocation2 + $0xd8] sm:$0xff]  ;;  %v237_v44 = vld [vmem:[#allocation2 + $0xe0] sm:$0xff] }
  0x41   :  { %476 = vmatprep.subr.bf16.mxu0 %v607_v1  ;;  %v486_v42 = vpack.c.bf16 %v235_v41, %v234_v40  ;;  %v489_v45 = vpack.c.bf16 %v237_v44, %v236_v43  ;;  %v238_v46 = vld [vmem:[#allocation2 + $0xe8] sm:$0xff]  ;;  %v239_v47 = vld [vmem:[#allocation2 + $0xf0] sm:$0xff]  ;;  %v240_v54 = vld [vmem:[#allocation2 + $0xf8] sm:$0xff] }
  0x42   :  { %v492_v48 = vpack.c.bf16 %v239_v47, %v238_v46  ;;  %v334_v49 = vld [vmem:[#allocation5] ss:$0 sm:$0xff]  ;;  %v241_v55 = vld [vmem:[#allocation2 + $0x100] sm:$0xff]  ;;  %v336_v57 = vld [vmem:[#allocation5 + $0x1] ss:$0 sm:$0xff] }
  0x43   :  { %457 = vmatpush3.bf16.msra.mxu1 %v456_v12  ;;  %v495_v56 = vpack.c.bf16 %v241_v55, %v240_v54  ;;  %v337_v62 = vld [vmem:[#allocation5 + $0x2] ss:$0 sm:$0xff] }
  0x44   :  { %458 = vmatprep.subr.bf16.mxu1 %v607_v1  ;;  %478 = vmatpush3.bf16.msra.mxu0 %v477_v33 }
  0x45   :  { %479 = vmatprep.subr.bf16.mxu0 %v607_v1 }
  0x47   :  { %460 = vmatpush3.bf16.msra.mxu1 %v459_v15 }
  0x48   :  { %461 = vmatprep.subr.bf16.mxu1 %v607_v1  ;;  %481 = vmatpush3.bf16.msra.mxu0 %v480_v36 }
  0x49   :  { %482 = vmatprep.subr.bf16.mxu0 %v607_v1 }
  0x4b   :  { %463 = vmatpush3.bf16.msra.mxu1 %v462_v18 }
  0x4c   :  { %464 = vmatprep.subr.bf16.mxu1 %v607_v1  ;;  %484 = vmatpush3.bf16.msra.mxu0 %v483_v39 }
  0x4d   :  { %485 = vmatprep.subr.bf16.mxu0 %v607_v1 }
  0x4f   :  { %466 = vmatpush3.bf16.msra.mxu1 %v465_v21 }
  0x50   :  { %467 = vmatprep.subr.bf16.mxu1 %v607_v1  ;;  %487 = vmatpush3.bf16.msra.mxu0 %v486_v42 }
  0x51   :  { %488 = vmatprep.subr.bf16.mxu0 %v607_v1 }
  0x53   :  { %469 = vmatpush3.bf16.msra.mxu1 %v468_v24 }
  0x54   :  { %470 = vmatprep.subr.bf16.mxu1 %v607_v1  ;;  %490 = vmatpush3.bf16.msra.mxu0 %v489_v45 }
  0x55   :  { %491 = vmatprep.subr.bf16.mxu0 %v607_v1 }
  0x57   :  { %472 = vmatpush3.bf16.msra.mxu1 %v471_v27 }
  0x58   :  { %493 = vmatpush3.bf16.msra.mxu0 %v492_v48 }
  0x59   :  { %494 = vmatprep.subr.bf16.mxu0 %v607_v1 }
  0x5c   :  { %496 = vmatpush3.bf16.msra.mxu0 %v495_v56 }
 0x10d   :  { %v129_v50 = vpop.f32.mrb[0].mxu0 }
 0x10e   :  { %v130_v51 = vadd.f32 %v334_v49, %v129_v50  ;;  %v378_v52 = vpop.f32.mrb[1].mxu0 }
 0x110   :  { %v133_v53 = vmax.f32 %v130_v51, 0.0 }
 0x112   :  { %412 = vmatmul.mubr.f32.vlgmr.msra.gmra.mrb[0].mxu1 %v133_v53 }
 0x1e5   :  { %v221_v58 = vpop.f32.mrb[0].mxu1 }
 0x1e6   :  { %v222_v59 = vadd.f32 %v336_v57, %v221_v58  ;;  %v413_v60 = vpop.f32.mrb[1].mxu1 }
 0x1e8   :  { %v225_v61 = vmax.f32 %v222_v59, 0.0 }
 0x1ea   :  { %447 = vmatmul.mubr.f32.vlgmr.msra.gmra.mrb[2].mxu0 %v225_v61 }
 0x2bd   :  { %v313_v63 = vpop.f32.mrb[2].mxu0 }
 0x2be   :  { %v314_v0 = vadd.f32 %v337_v62, %v313_v63  ;;  %v448_v1 = vpop.f32.mrb[3].mxu0 }
 0x2c0   :  { %317 = vst [vmem:[#allocation8] sm:$0xff] %v314_v0 }
 0x2c1   :  { %583 = shalt.err (!%p580_p0)
}
 0x2c2   :  { %s584_s25 = scalar_lea.hbm %s706_s3, 128 }
 0x2c3   :  { %p585_p1 = scmp.ne.s32.totalorder %s706_s3, %s584_s25  ;;  %p588_p2 = scmp.lt.u32.totalorder %s584_s25, %s706_s3 }
 0x2c5   :  { %p590_p3 = pnand %p588_p2, %p585_p1 }
 0x2c7   :  { %593 = shalt.err (!%p590_p3)
}
 0x2c8   :  { %327 = dma.vmem_to_hbm [thread:$0]  %s325_s21, 128, %s706_s3, [#allocation4]  }
 0x2c9   :  { %598 = dma.done.wait [#allocation4], 128  }
 0x2ca   :  { %599 = vsyncadd [#allocation4], 4294967168 }
 0x2cb   :  { %331 = vsyncpa [#allocation3], 1 }
 0x2cc   :  { %332 = vsyncpa [#allocation6], 1 }
 0x2cd   :  { %333 = vsyncpa [#allocation4], 1 }

</bundles_post_ra>
